<compile_context>
chip_gen: v7x
topology: tpu7x:2x2x1
jax: 0.10.0
libtpu: 0.0.40
codegen_flags: <defaults>
</compile_context>

<pallas_src>
import numpy as np
import jax
import jax.numpy as jnp
from jax.experimental import pallas as pl
from jax.experimental.pallas import tpu as pltpu

# Small shapes consistent with the module:
#   L = number of top layers averaged (num_wrapper_layers), B = batch,
#   S = sequence length, H = hidden size (128 keeps the lane axis full).
L, B, S, H = 6, 2, 8, 128


def mean_tanh_kernel(hs_ref, out_ref):
    """Single invocation over the whole (flattened) tensor.

    hs_ref  : (L, B*S, H)  stacked top-layer hidden states, VMEM-resident
    out_ref : (B*S, H)     tanh(mean over the layer axis)
    """
    num_layers = hs_ref.shape[0]
    # Accumulate in f32 (even if inputs are bf16) — lives entirely in vregs.
    acc = hs_ref[0].astype(jnp.float32)
    for l in range(1, num_layers):        # static unroll: pure VPU adds
        acc = acc + hs_ref[l].astype(jnp.float32)
    mean = acc * (1.0 / num_layers)
    out_ref[...] = jnp.tanh(mean).astype(out_ref.dtype)


def bert_wrapper_mean(hidden_states_stacked, attention_mask=None):
    """hidden_states_stacked: (L, B, S, H) = torch.stack(hidden_states[-L:]).

    attention_mask is accepted for API parity but unused (matches the spec).
    """
    del attention_mask
    Lc, Bc, Sc, Hc = hidden_states_stacked.shape
    # Layout-preserving flatten of (B, S) onto the sublane axis.
    hs_flat = hidden_states_stacked.reshape(Lc, Bc * Sc, Hc)
    out_flat = pl.pallas_call(
        mean_tanh_kernel,
        out_shape=jax.ShapeDtypeStruct((Bc * Sc, Hc), hidden_states_stacked.dtype),
        # Whole-array blocks, no grid: one contiguous HBM->VMEM DMA each way.
        in_specs=[pl.BlockSpec(memory_space=pltpu.MemorySpace.VMEM)],
        out_specs=pl.BlockSpec(memory_space=pltpu.MemorySpace.VMEM),
    )(hs_flat)
    return out_flat.reshape(Bc, Sc, Hc)


# ---------------------------- pure-JAX reference -----------------------------
def reference(hidden_states_stacked):
    return jnp.tanh(jnp.mean(hidden_states_stacked.astype(jnp.float32), axis=0)
                    ).astype(hidden_states_stacked.dtype)


if __name__ == "__main__":
    key = jax.random.PRNGKey(0)
    k1, k2 = jax.random.split(key)

    # stacked hidden_states[-L:]  -> (L, B, S, H)
    hs = jax.random.normal(k1, (L, B, S, H), jnp.float32)
    # attention mask exists in the API but is unused by BertWrapperMean.forward
    mask = (jax.random.uniform(k2, (B, S)) > 0.2).astype(jnp.float32)

    out = bert_wrapper_mean(hs, mask)
    out = jax.block_until_ready(out)
    assert out.shape == (B, S, H)

    ref = reference(hs)
    # atol loosened to 1e-5: EUP tanh approximation vs XLA tanh can differ by
    # slightly more than 1e-6 in f32.
    np.testing.assert_allclose(np.asarray(out), np.asarray(ref),
                               rtol=1e-5, atol=1e-5)
    print("KERNEL_OK")
</pallas_src>

<mosaic_0001>
module attributes {stable_mosaic.version = 11 : i64} {
  func.func @mean_tanh_kernel(%arg0: memref<6x16x128xf32, #tpu.memory_space<vmem>>, %arg1: memref<16x128xf32, #tpu.memory_space<vmem>>) attributes {dimension_semantics = [], scalar_prefetch = 0 : i64, scratch_operands = 0 : i64, tpu.core_type = #tpu.core_type<tc>} {
    %c0 = arith.constant 0 : index
    %c0_0 = arith.constant 0 : index
    %c0_1 = arith.constant 0 : index
    %0 = vector.load %arg0[%c0, %c0_0, %c0_1] : memref<6x16x128xf32, #tpu.memory_space<vmem>>, vector<1x16x128xf32>
    %1 = vector.shape_cast %0 : vector<1x16x128xf32> to vector<16x128xf32>
    %c1 = arith.constant 1 : index
    %c0_2 = arith.constant 0 : index
    %c0_3 = arith.constant 0 : index
    %2 = vector.load %arg0[%c1, %c0_2, %c0_3] : memref<6x16x128xf32, #tpu.memory_space<vmem>>, vector<1x16x128xf32>
    %3 = vector.shape_cast %2 : vector<1x16x128xf32> to vector<16x128xf32>
    %4 = arith.addf %1, %3 : vector<16x128xf32>
    %c2 = arith.constant 2 : index
    %c0_4 = arith.constant 0 : index
    %c0_5 = arith.constant 0 : index
    %5 = vector.load %arg0[%c2, %c0_4, %c0_5] : memref<6x16x128xf32, #tpu.memory_space<vmem>>, vector<1x16x128xf32>
    %6 = vector.shape_cast %5 : vector<1x16x128xf32> to vector<16x128xf32>
    %7 = arith.addf %4, %6 : vector<16x128xf32>
    %c3 = arith.constant 3 : index
    %c0_6 = arith.constant 0 : index
    %c0_7 = arith.constant 0 : index
    %8 = vector.load %arg0[%c3, %c0_6, %c0_7] : memref<6x16x128xf32, #tpu.memory_space<vmem>>, vector<1x16x128xf32>
    %9 = vector.shape_cast %8 : vector<1x16x128xf32> to vector<16x128xf32>
    %10 = arith.addf %7, %9 : vector<16x128xf32>
    %c4 = arith.constant 4 : index
    %c0_8 = arith.constant 0 : index
    %c0_9 = arith.constant 0 : index
    %11 = vector.load %arg0[%c4, %c0_8, %c0_9] : memref<6x16x128xf32, #tpu.memory_space<vmem>>, vector<1x16x128xf32>
    %12 = vector.shape_cast %11 : vector<1x16x128xf32> to vector<16x128xf32>
    %13 = arith.addf %10, %12 : vector<16x128xf32>
    %c5 = arith.constant 5 : index
    %c0_10 = arith.constant 0 : index
    %c0_11 = arith.constant 0 : index
    %14 = vector.load %arg0[%c5, %c0_10, %c0_11] : memref<6x16x128xf32, #tpu.memory_space<vmem>>, vector<1x16x128xf32>
    %15 = vector.shape_cast %14 : vector<1x16x128xf32> to vector<16x128xf32>
    %16 = arith.addf %13, %15 : vector<16x128xf32>
    %cst = arith.constant 0.166666672 : f32
    %17 = vector.broadcast %cst : f32 to vector<16x128xf32>
    %18 = arith.mulf %16, %17 : vector<16x128xf32>
    %19 = math.tanh %18 : vector<16x128xf32>
    %c0_12 = arith.constant 0 : index
    %c0_13 = arith.constant 0 : index
    %20 = vector.load %arg1[%c0_12, %c0_13] : memref<16x128xf32, #tpu.memory_space<vmem>>, vector<16x128xf32>
    tpu.vector_store %arg1[%c0_12, %c0_13], %19 {strides = array<i32>} : memref<16x128xf32, #tpu.memory_space<vmem>>, vector<16x128xf32>,
    return
  }
}

</mosaic_0001>

<bundles_post_ra>
// kernel: tpu_custom_call.1
= control target key start
LH: loop header
LB: loop body
LE: loop exit
PB: predicated region body
PF: predicated region fallthrough
CT: control target
= control target key end

     0   :  { %6 = vsyncpa [#allocation3], 0  ;;  %s173_s0 = inlined_call_operand.hbm [shape: f32[6,16,128], index: 0, kind: input, shape index: {}]   ;;  %s174_s1 = inlined_call_operand.hbm [shape: f32[16,128], index: 1, kind: output, shape index: {}]  }
   0x1   :  { %7 = vsyncpa [#allocation4], 0  ;;  %s129_s6 = smov [#allocation2]   ;;  %s81_s10 = scalar_lea.hbm %s173_s0, 1536 }
   0x2   :  { %s13_s7 = sshll.u32 %s129_s6, 4  ;;  %p82_p0 = scmp.ne.s32.totalorder %s173_s0, %s81_s10  ;;  %s14_s7 = int_to_ptr.vmem [resolvable:$true] %s13_s7 }
   0x3   :  { %p85_p1 = scmp.lt.u32.totalorder %s81_s10, %s173_s0 }
   0x5   :  { %p87_p2 = pnand %p85_p1, %p82_p0 }
   0x7   :  { %90 = shalt.err (!%p87_p2)
}
   0x8   :  { %s91_s15 = scalar_lea.vmem %s14_s7, 1536  ;;  %p96_p4 = scmp.lt.s32.totalorder %s14_s7, %s14_s7 }
   0x9   :  { %p92_p3 = scmp.ne.s32.totalorder %s14_s7, %s91_s15  ;;  %p97_p5 = scmp.lt.s32.totalorder %s91_s15, %s91_s15 }
   0xb   :  { %p98_p6 = por %p97_p5, %p96_p4 }
   0xd   :  { %p99_p7 = pnand %p98_p6, %p92_p3 }
   0xf   :  { %102 = shalt.err (!%p99_p7)
}
  0x10   :  { %s130_s16 = smov 128   ;;  %s131_s17 = smov 8  }
  0x11   :  { %19 = dma.hbm_to_vmem [thread:$0]  %s173_s0, 1536, %s14_s7, [#allocation3], %s130_s16, %s130_s16, %s131_s17  }
  0x12   :  { %125 = dma.done.wait [#allocation3], 1536  }
  0x13   :  { %126 = vsyncadd [#allocation3], 4294965760  ;;  %v23_v0 = vld [vmem:[#allocation2] sm:$0xff]  ;;  %v26_v1 = vld [vmem:[#allocation2 + $0x10] sm:$0xff]  ;;  %s132_s0 = smov [#allocation5]  }
  0x14   :  { %v31_v2 = vld [vmem:[#allocation2 + $0x20] sm:$0xff]  ;;  %v28_v3 = vadd.f32 %v26_v1, %v23_v0  ;;  %v36_v4 = vld [vmem:[#allocation2 + $0x30] sm:$0xff]  ;;  %v24_v5 = vld [vmem:[#allocation2 + $0x8] sm:$0xff]  ;;  %s61_s20 = sshll.u32 %s132_s0, 4  ;;  %s62_s20 = int_to_ptr.vmem [resolvable:$true] %s61_s20 }
  0x15   :  { %v27_v6 = vld [vmem:[#allocation2 + $0x18] sm:$0xff]  ;;  %v32_v7 = vld [vmem:[#allocation2 + $0x28] sm:$0xff]  ;;  %v41_v10 = vld [vmem:[#allocation2 + $0x40] sm:$0xff]  ;;  %s103_s21 = scalar_lea.vmem %s62_s20, 256  ;;  %p108_p9 = scmp.lt.s32.totalorder %s62_s20, %s62_s20 }
  0x16   :  { %v33_v8 = vadd.f32 %v31_v2, %v28_v3  ;;  %v29_v9 = vadd.f32 %v27_v6, %v24_v5  ;;  %v37_v11 = vld [vmem:[#allocation2 + $0x38] sm:$0xff]  ;;  %v46_v14 = vld [vmem:[#allocation2 + $0x50] sm:$0xff]  ;;  %v42_v15 = vld [vmem:[#allocation2 + $0x48] sm:$0xff]  ;;  %p104_p8 = scmp.ne.s32.totalorder %s62_s20, %s103_s21  ;;  %p109_p10 = scmp.lt.s32.totalorder %s103_s21, %s103_s21 }
  0x17   :  { %v47_v18 = vld [vmem:[#allocation2 + $0x58] sm:$0xff] }
  0x18   :  { %v38_v12 = vadd.f32 %v36_v4, %v33_v8  ;;  %v34_v13 = vadd.f32 %v32_v7, %v29_v9  ;;  %p110_p11 = por %p109_p10, %p108_p9 }
  0x1a   :  { %v43_v16 = vadd.f32 %v41_v10, %v38_v12  ;;  %v39_v17 = vadd.f32 %v37_v11, %v34_v13  ;;  %p111_p12 = pnand %p110_p11, %p104_p8 }
  0x1c   :  { %v48_v19 = vadd.f32 %v46_v14, %v43_v16  ;;  %v44_v20 = vadd.f32 %v42_v15, %v39_v17 }
  0x1e   :  { %v50_v21 = vmul.f32 0.16666667, %v48_v19  ;;  %v49_v22 = vadd.f32 %v47_v18, %v44_v20 }
  0x20   :  { %77 = vtanh.f32 %v50_v21  ;;  %v51_v23 = vmul.f32 0.16666667, %v49_v22 }
  0x22   :  { %79 = vtanh.f32 %v51_v23 }
  0x2a   :  { %v78_v24 = vpop.eup %77 }
  0x2b   :  { %54 = vst [vmem:[#allocation5] sm:$0xff] %v78_v24 }
  0x2c   :  { %v80_v25 = vpop.eup %79 }
  0x2d   :  { %55 = vst [vmem:[#allocation5 + $0x8] sm:$0xff] %v80_v25 }
  0x2e   :  { %114 = shalt.err (!%p111_p12)
}
  0x2f   :  { %s115_s24 = scalar_lea.hbm %s174_s1, 256 }
  0x30   :  { %p116_p13 = scmp.ne.s32.totalorder %s174_s1, %s115_s24  ;;  %p119_p0 = scmp.lt.u32.totalorder %s115_s24, %s174_s1 }
  0x32   :  { %p121_p1 = pnand %p119_p0, %p116_p13 }
  0x34   :  { %124 = shalt.err (!%p121_p1)
}
  0x35   :  { %67 = dma.vmem_to_hbm [thread:$0]  %s62_s20, 256, %s174_s1, [#allocation4], %s130_s16, %s130_s16, %s131_s17  }
  0x36   :  { %127 = dma.done.wait [#allocation4], 256  }
  0x37   :  { %128 = vsyncadd [#allocation4], 4294967040 }
  0x38   :  { %71 = vsyncpa [#allocation3], 1 }
  0x39   :  { %72 = vsyncpa [#allocation4], 1 }

</bundles_post_ra>
